<compile_context>
chip_gen: v7x
topology: tpu7x:2x2x1
jax: 0.10.0
libtpu: 0.0.40
codegen_flags: <defaults>
</compile_context>

<pallas_src>
import functools
import math

import jax
import jax.numpy as jnp
from jax import lax
from jax.experimental import pallas as pl
from jax.experimental.pallas import tpu as pltpu


def _round_up(v, m):
    return ((v + m - 1) // m) * m


def _choose_tiling(B, C, F, itemsize, tk_override=None):
    """Pick (B-tile, F-tile, vmem_limit_bytes) under a per-core VMEM budget."""
    # --- B tile: only split when B is sublane-aligned and large enough to give >= 2
    #     tiles. The B axis is marked "parallel" -> megacore / v7x 2-TC sharding.
    bt = B
    if B >= 16 and B % 8 == 0:
        for cand in (256, 128, 64, 32, 16, 8):
            if cand <= B // 2 and B % cand == 0:
                bt = cand
                break

    # --- VMEM budget. v7x: 64 MiB/TC; v5e/v6e: 128 MiB. Query when possible, fall
    #     back to the most conservative (v7x) figure.
    try:
        cap = int(pltpu.get_tpu_info().vmem_capacity_bytes)
    except Exception:
        cap = 64 << 20
    data_budget = (cap * 3 // 4) // 2          # leave half the scoped window for Mosaic

    resident = 3 * bt * C * 4 + 2 * (8 * 128 * 4)   # target (x2 buf) + acc + sse blocks
    per_f = 2 * (bt + C) * itemsize                 # double-buffered x-tile + W-tile, per F elem
    max_tk = max(128, ((data_budget - resident) // per_f) // 128 * 128)

    if tk_override is not None:
        tk = F if tk_override >= F else max(128, (tk_override // 128) * 128)
    elif F <= max_tk and per_f * F <= (4 << 20):
        # Whole-F block is small: collapse the reduction grid (single step); anything
        # bigger would expose multi-MiB DMAs with no compute overlap.
        tk = F
    else:
        # Moderate lane-aligned tile: keeps the DMA pipelined behind the MXU and
        # guarantees >= 2 reduction steps.
        tk = min(max_tk, 8192, _round_up(pl.cdiv(F, 2), 128))
        tk = max(tk, 128)

    need = per_f * min(tk, F) + resident
    vmem_limit = int(min(max(2 * need + (4 << 20), 32 << 20), cap * 3 // 4))
    return bt, tk, vmem_limit


def it_loss_kernel(x_ref, wt_ref, tgt_ref, sse_ref, acc_ref, *, f_total, tk, ragged):
    """One (B-tile, F-tile) grid step.

    x_ref:   (bt, tk)    in_dtype -- F-tile of the flattened input (lane-dense along F)
    wt_ref:  (C,  tk)    in_dtype -- F-tile of W in [C, F] layout   (lane-dense along F)
    tgt_ref: (bt, C)     f32      -- target block for this B-tile (resident across F)
    sse_ref: (1, 8, 128) f32      -- per-B-tile partial sum of squared errors (splat)
    acc_ref: (bt, C)     f32      -- G accumulator (G output block when return_g, else scratch)
    """
    k = pl.program_id(1)

    @pl.when(k == 0)
    def _():
        acc_ref[...] = jnp.zeros_like(acc_ref)

    x = x_ref[...]
    w = wt_ref[...]
    if ragged:
        # Final F-tile overhangs F: zero the out-of-range lanes of both operands.
        # jnp.where (select), not multiply, so unspecified OOB values (incl. NaN) die.
        lane = jax.lax.broadcasted_iota(jnp.int32, (1, tk), 1)
        valid = (k * tk + lane) < f_total
        x = jnp.where(valid, x, jnp.zeros_like(x))
        w = jnp.where(valid, w, jnp.zeros_like(w))

    # Contract the lane (F) dim of both operands; f32 accumulation on the MXU.
    # C == 5 << 128, so the (C, tk) -> (tk, C) transpose Mosaic inserts costs a couple
    # of XLU vxpose per tile (negligible). If C ever grows toward >= 128, switch W to
    # the MXU-native (tk, C) HBM layout instead.
    acc_ref[...] += lax.dot_general(
        x, w,
        dimension_numbers=(((1,), (1,)), ((), ())),
        preferred_element_type=jnp.float32,
    )

    @pl.when(k == pl.num_programs(1) - 1)
    def _():
        diff = acc_ref[...] - tgt_ref[...]
        # Full-vreg splat store (unmasked vst). The tiny cross-B-tile sum + mean is
        # done in the wrapper so the B axis can stay "parallel" (megacore / v7x 2-TC).
        sse_ref[...] = jnp.broadcast_to(jnp.sum(diff * diff), sse_ref.shape)


def it_loss_forward(x, w_cf, target, *, tk=None, return_g=False):
    """G = x.reshape(B,-1) @ w_cf.T ; loss = mean((G - target)**2). Returns (x, loss[, G])."""
    B = x.shape[0]
    F = math.prod(x.shape[1:])
    C = w_cf.shape[0]
    assert w_cf.shape == (C, F) and target.shape == (B, C)

    in_dtype = w_cf.dtype
    x_flat = x.reshape(B, F).astype(in_dtype)     # contiguous NCHW reshape is free; cast once
    tgt = target.astype(jnp.float32)

    bt, tk, vmem_limit = _choose_tiling(B, C, F, jnp.dtype(in_dtype).itemsize, tk)
    num_bt = B // bt
    num_k = pl.cdiv(F, tk)
    ragged = (F % tk) != 0

    kernel = functools.partial(it_loss_kernel, f_total=F, tk=tk, ragged=ragged)

    sse_shape = jax.ShapeDtypeStruct((num_bt, 8, 128), jnp.float32)
    sse_spec = pl.BlockSpec((1, 8, 128), lambda b, k: (b, 0, 0))

    in_specs = [
        pl.BlockSpec((bt, tk), lambda b, k: (b, k)),   # x tile along (B, F)
        pl.BlockSpec((C, tk), lambda b, k: (0, k)),    # W tile ([C, F] layout, lane-dense F)
        pl.BlockSpec((bt, C), lambda b, k: (b, 0)),    # target (resident across F)
    ]
    if return_g:
        out_shape = (sse_shape, jax.ShapeDtypeStruct((B, C), jnp.float32))
        out_specs = [sse_spec, pl.BlockSpec((bt, C), lambda b, k: (b, 0))]
        scratch_shapes = []
    else:
        out_shape = (sse_shape,)
        out_specs = [sse_spec]
        scratch_shapes = [pltpu.VMEM((bt, C), jnp.float32)]

    outs = pl.pallas_call(
        kernel,
        out_shape=out_shape,
        grid_spec=pltpu.PrefetchScalarGridSpec(
            num_scalar_prefetch=0,
            grid=(num_bt, num_k),
            in_specs=in_specs,
            out_specs=out_specs,
            scratch_shapes=scratch_shapes,
        ),
        compiler_params=pltpu.CompilerParams(
            dimension_semantics=("parallel", "arbitrary"),  # B-tiles parallel, F is reduced
            vmem_limit_bytes=vmem_limit,
        ),
    )(x_flat, w_cf, tgt)

    loss = jnp.sum(outs[0][:, 0, 0]) * (1.0 / float(B * C))   # mse 'mean' over B*C elements
    if return_g:
        return x, loss, outs[1]
    return x, loss


class ITLoss:
    """JAX/Pallas port of IT_Loss. Caches W in [C, F] layout and the f32 target at init."""

    def __init__(self, target_response, weights, rand_vec=None, vec_mag=None,
                 input_dtype=jnp.bfloat16):
        # TODO(synk): load_fit_weights() reads a pickle from disk; here the [C, F]
        # weights array (exactly what that file provides) is passed in directly.
        w = jnp.asarray(weights)
        self.C, self.F = w.shape
        # Kernel operand: keep the natural [C, F] (lane-dense along F) layout, cast once
        # at init — no per-forward transpose or extra HBM pass over W.
        self.W_cf = w.astype(input_dtype)
        # target = target_response @ weights.T  (one-off f32 glue, matches torch init)
        tgt = jnp.einsum("bf,cf->bc",
                         jnp.asarray(target_response, jnp.float32),
                         w.astype(jnp.float32))
        if rand_vec is not None:
            tgt = tgt + vec_mag * jnp.asarray(rand_vec, jnp.float32)
        self.target = tgt
        self.loss = None
        self.G = None

    def __call__(self, x, *, tk=None, return_g=False):
        out = it_loss_forward(x, self.W_cf, self.target, tk=tk, return_g=return_g)
        if return_g:
            x_out, self.loss, self.G = out
        else:
            x_out, self.loss = out
        return x_out          # forward() returns its input unchanged


if __name__ == "__main__":
    B, C_in, H, Wd = 2, 4, 16, 16
    F = C_in * H * Wd                         # 1024
    N_COMP = 5                                # 5-component IT fit -> weights is [5, F]

    key = jax.random.PRNGKey(0)
    k_x, k_w, k_t, k_x2, k_t2 = jax.random.split(key, 5)

    x = jax.random.normal(k_x, (B, C_in, H, Wd), dtype=jnp.float32)
    weights = jax.random.normal(k_w, (N_COMP, F), dtype=jnp.float32) * 0.01   # [C, F]
    target_response = jax.random.normal(k_t, (B, F), dtype=jnp.float32)

    crit = ITLoss(target_response, weights)        # bf16 operands by default
    tgt = crit.target

    # Pure-JAX references.
    W_fc = weights.T.astype(jnp.float32)           # [F, C] == torch's self.W
    G_ref_f32 = jnp.matmul(x.reshape(B, -1), W_fc)
    loss_ref_f32 = jnp.mean((G_ref_f32 - tgt) ** 2)
    G_ref_bf16 = jnp.matmul(x.reshape(B, -1).astype(jnp.bfloat16),
                            weights.T.astype(jnp.bfloat16),
                            preferred_element_type=jnp.float32)
    loss_ref_bf16 = jnp.mean((G_ref_bf16 - tgt) ** 2)

    # 1) Production path: bf16 operands, collapsed grid, loss-only output (no G writeback).
    out_x = crit(x)
    jax.block_until_ready((out_x, crit.loss))
    assert jnp.array_equal(out_x, x)                                  # forward returns input
    assert jnp.allclose(crit.loss, loss_ref_bf16, rtol=2e-3, atol=2e-4)
    assert jnp.allclose(crit.loss, loss_ref_f32, rtol=5e-2, atol=1e-3)

    # 2) Tiled + ragged F path (tk=384 does not divide F=1024 -> in-kernel tail mask), G exposed.
    crit(x, tk=384, return_g=True)
    jax.block_until_ready((crit.loss, crit.G))
    assert jnp.allclose(crit.G, G_ref_bf16, rtol=2e-3, atol=2e-4)
    assert jnp.allclose(crit.loss, loss_ref_bf16, rtol=2e-3, atol=2e-4)

    # 3) f32 operands reproduce the torch numerics tightly.
    crit32 = ITLoss(target_response, weights, input_dtype=jnp.float32)
    crit32(x, return_g=True)
    jax.block_until_ready((crit32.loss, crit32.G))
    assert jnp.allclose(crit32.G, G_ref_f32, rtol=1e-4, atol=1e-4)
    assert jnp.allclose(crit32.loss, loss_ref_f32, rtol=1e-4, atol=1e-4)

    # 4) Larger batch: exercises the parallel B-tile axis (bt=8 -> num_bt=2) and per-tile partials.
    B2 = 16
    x2 = jax.random.normal(k_x2, (B2, C_in, H, Wd), dtype=jnp.float32)
    tr2 = jax.random.normal(k_t2, (B2, F), dtype=jnp.float32)
    crit2 = ITLoss(tr2, weights)
    crit2(x2, return_g=True)
    jax.block_until_ready((crit2.loss, crit2.G))
    G2_ref = jnp.matmul(x2.reshape(B2, -1).astype(jnp.bfloat16),
                        weights.T.astype(jnp.bfloat16),
                        preferred_element_type=jnp.float32)
    loss2_ref = jnp.mean((G2_ref - crit2.target) ** 2)
    assert jnp.allclose(crit2.G, G2_ref, rtol=2e-3, atol=2e-4)
    assert jnp.allclose(crit2.loss, loss2_ref, rtol=2e-3, atol=2e-4)

    print("KERNEL_OK")
</pallas_src>

<mosaic_0001>
module attributes {stable_mosaic.version = 11 : i64} {
  func.func @it_loss_kernel(%arg0: i32, %arg1: i32, %arg2: memref<2x1024xbf16, #tpu.memory_space<vmem>>, %arg3: memref<5x1024xbf16, #tpu.memory_space<vmem>>, %arg4: memref<2x5xf32, #tpu.memory_space<vmem>>, %arg5: memref<1x8x128xf32, #tpu.memory_space<vmem>>, %arg6: memref<2x5xf32, #tpu.memory_space<vmem>>) attributes {dimension_semantics = [#tpu.dimension_semantics<parallel>, #tpu.dimension_semantics<arbitrary>], iteration_bounds = array<i64: 1, 1>, scalar_prefetch = 0 : i64, scratch_operands = 1 : i64, tpu.core_type = #tpu.core_type<tc>, window_params = [{transform_indices = @transform_0, window_bounds = array<i64: 2, 1024>}, {transform_indices = @transform_1, window_bounds = array<i64: 5, 1024>}, {transform_indices = @transform_2, window_bounds = array<i64: 2, 5>}, {transform_indices = @transform_3, window_bounds = array<i64: 1, 8, 128>}]} {
    %c0_i32 = arith.constant 0 : i32
    %0 = arith.cmpi eq, %arg1, %c0_i32 : i32
    %1 = arith.extui %0 : i1 to i32
    %c0_i32_0 = arith.constant 0 : i32
    %2 = arith.cmpi ne, %1, %c0_i32_0 : i32
    scf.if %2 {
      %cst_10 = arith.constant 0.000000e+00 : f32
      %12 = vector.broadcast %cst_10 : f32 to vector<2x5xf32>
      %c0_11 = arith.constant 0 : index
      %c0_12 = arith.constant 0 : index
      %13 = vector.load %arg6[%c0_11, %c0_12] : memref<2x5xf32, #tpu.memory_space<vmem>>, vector<2x5xf32>
      tpu.vector_store %arg6[%c0_11, %c0_12], %12 {strides = array<i32>} : memref<2x5xf32, #tpu.memory_space<vmem>>, vector<2x5xf32>,
    } else {
    }
    %c0 = arith.constant 0 : index
    %c0_1 = arith.constant 0 : index
    %3 = vector.load %arg2[%c0, %c0_1] : memref<2x1024xbf16, #tpu.memory_space<vmem>>, vector<2x1024xbf16>
    %c0_2 = arith.constant 0 : index
    %c0_3 = arith.constant 0 : index
    %4 = vector.load %arg3[%c0_2, %c0_3] : memref<5x1024xbf16, #tpu.memory_space<vmem>>, vector<5x1024xbf16>
    %c0_4 = arith.constant 0 : index
    %c0_5 = arith.constant 0 : index
    %5 = vector.load %arg6[%c0_4, %c0_5] : memref<2x5xf32, #tpu.memory_space<vmem>>, vector<2x5xf32>
    %cst = arith.constant dense<0.000000e+00> : vector<2x5xf32>
    %6 = tpu.matmul %3, %4, %cst {dimension_numbers = #tpu.dot_dimension_numbers<[1], [1], [0], [0], [0, 0, 1, 0], [], []>} : vector<2x1024xbf16>, vector<5x1024xbf16>, vector<2x5xf32> -> vector<2x5xf32>
    %7 = arith.addf %5, %6 : vector<2x5xf32>
    %c0_6 = arith.constant 0 : index
    %c0_7 = arith.constant 0 : index
    %8 = vector.load %arg6[%c0_6, %c0_7] : memref<2x5xf32, #tpu.memory_space<vmem>>, vector<2x5xf32>
    tpu.vector_store %arg6[%c0_6, %c0_7], %7 {strides = array<i32>} : memref<2x5xf32, #tpu.memory_space<vmem>>, vector<2x5xf32>,
    %c0_i32_8 = arith.constant 0 : i32
    %9 = arith.cmpi eq, %arg1, %c0_i32_8 : i32
    %10 = arith.extui %9 : i1 to i32
    %c0_i32_9 = arith.constant 0 : i32
    %11 = arith.cmpi ne, %10, %c0_i32_9 : i32
    scf.if %11 {
      %c0_10 = arith.constant 0 : index
      %c0_11 = arith.constant 0 : index
      %12 = vector.load %arg6[%c0_10, %c0_11] : memref<2x5xf32, #tpu.memory_space<vmem>>, vector<2x5xf32>
      %c0_12 = arith.constant 0 : index
      %c0_13 = arith.constant 0 : index
      %13 = vector.load %arg4[%c0_12, %c0_13] : memref<2x5xf32, #tpu.memory_space<vmem>>, vector<2x5xf32>
      %14 = arith.subf %12, %13 : vector<2x5xf32>
      %15 = arith.mulf %14, %14 : vector<2x5xf32>
      %16 = vector.shape_cast %15 : vector<2x5xf32> to vector<1x2x5xf32>
      %cst_14 = arith.constant dense<0.000000e+00> : vector<1xf32>
      %17 = vector.multi_reduction <add>, %16, %cst_14 [1, 2] : vector<1x2x5xf32> to vector<1xf32>
      %18 = vector.shape_cast %17 : vector<1xf32> to vector<1x1x1xf32>
      %19 = vector.extract %18[0, 0, 0] : f32 from vector<1x1x1xf32>
      %20 = vector.broadcast %19 : f32 to vector<1x8x128xf32>
      %c0_15 = arith.constant 0 : index
      %c0_16 = arith.constant 0 : index
      %c0_17 = arith.constant 0 : index
      %21 = vector.load %arg5[%c0_15, %c0_16, %c0_17] : memref<1x8x128xf32, #tpu.memory_space<vmem>>, vector<1x8x128xf32>
      tpu.vector_store %arg5[%c0_15, %c0_16, %c0_17], %20 {strides = array<i32>} : memref<1x8x128xf32, #tpu.memory_space<vmem>>, vector<1x8x128xf32>,
    } else {
    }
    return
  }
  func.func @transform_0(%arg0: i32, %arg1: i32) -> (i32, i32) {
    %c0_i32 = arith.constant 0 : i32
    return %arg0, %arg1 : i32, i32
  }
  func.func @transform_1(%arg0: i32, %arg1: i32) -> (i32, i32) {
    %c0_i32 = arith.constant 0 : i32
    %c0_i32_0 = arith.constant 0 : i32
    return %c0_i32, %arg1 : i32, i32
  }
  func.func @transform_2(%arg0: i32, %arg1: i32) -> (i32, i32) {
    %c0_i32 = arith.constant 0 : i32
    %c0_i32_0 = arith.constant 0 : i32
    return %arg0, %c0_i32 : i32, i32
  }
  func.func @transform_3(%arg0: i32, %arg1: i32) -> (i32, i32, i32) {
    %c0_i32 = arith.constant 0 : i32
    %c0_i32_0 = arith.constant 0 : i32
    %c0_i32_1 = arith.constant 0 : i32
    return %arg0, %c0_i32, %c0_i32_0 : i32, i32, i32
  }
}

</mosaic_0001>

<bundles_post_ra>
// kernel: tpu_custom_call.1
= control target key start
LH: loop header
LB: loop body
LE: loop exit
PB: predicated region body
PF: predicated region fallthrough
CT: control target
= control target key end

     0   :  { %8 = vsyncpa [#allocation4], 0  ;;  %s499_s0 = inlined_call_operand.hbm [shape: bf16[2,1024], index: 0, kind: input, shape index: {}]   ;;  %s500_s1 = inlined_call_operand.hbm [shape: bf16[5,1024], index: 1, kind: input, shape index: {}]   ;;  %s501_s2 = inlined_call_operand.vmem [shape: f32[2,5], index: 2, kind: input, shape index: {}]   ;;  %s502_s3 = inlined_call_operand.hbm [shape: f32[1,8,128], index: 3, kind: output, shape index: {}]  }
   0x1   :  { %9 = vsyncpa [#allocation7], 0 }
   0x2   :  { %10 = vsyncpa [#allocation5], 0  ;;  %s432_s12 = smov [#allocation3]   ;;  %s433_s14 = smov [#allocation6]  }
   0x3   :  { %s17_s13 = sshll.u32 %s432_s12, 4  ;;  %s27_s15 = sshll.u32 %s433_s14, 4  ;;  %s18_s13 = int_to_ptr.vmem [resolvable:$true] %s17_s13  ;;  %s28_s15 = int_to_ptr.vmem [resolvable:$true] %s27_s15 }
   0x4   :  { %s360_s18 = scalar_lea.hbm %s499_s0, 128 }
   0x5   :  { %p361_p0 = scmp.ne.s32.totalorder %s499_s0, %s360_s18  ;;  %p364_p1 = scmp.lt.u32.totalorder %s360_s18, %s499_s0 }
   0x7   :  { %p366_p2 = pnand %p364_p1, %p361_p0 }
   0x9   :  { %369 = shalt.err (!%p366_p2)
}
   0xa   :  { %s370_s23 = scalar_lea.vmem %s18_s13, 128  ;;  %p375_p4 = scmp.lt.s32.totalorder %s18_s13, %s18_s13 }
   0xb   :  { %p371_p3 = scmp.ne.s32.totalorder %s18_s13, %s370_s23  ;;  %p376_p5 = scmp.lt.s32.totalorder %s370_s23, %s370_s23 }
   0xd   :  { %p377_p6 = por %p376_p5, %p375_p4 }
   0xf   :  { %p378_p7 = pnand %p377_p6, %p371_p3 }
  0x11   :  { %381 = shalt.err (!%p378_p7)
}
  0x12   :  { %20 = dma.hbm_to_vmem [thread:$0]  %s499_s0, 128, %s18_s13, [#allocation4]  }
  0x13   :  { %s382_s28 = scalar_lea.hbm %s500_s1, 512 }
  0x14   :  { %p383_p8 = scmp.ne.s32.totalorder %s500_s1, %s382_s28  ;;  %p386_p9 = scmp.lt.u32.totalorder %s382_s28, %s500_s1 }
  0x16   :  { %p388_p10 = pnand %p386_p9, %p383_p8 }
  0x18   :  { %391 = shalt.err (!%p388_p10)
}
  0x19   :  { %s392_s6 = scalar_lea.vmem %s28_s15, 512  ;;  %p397_p12 = scmp.lt.s32.totalorder %s28_s15, %s28_s15 }
  0x1a   :  { %p393_p11 = scmp.ne.s32.totalorder %s28_s15, %s392_s6  ;;  %p398_p13 = scmp.lt.s32.totalorder %s392_s6, %s392_s6 }
  0x1c   :  { %p399_p0 = por %p398_p13, %p397_p12 }
  0x1e   :  { %p400_p1 = pnand %p399_p0, %p393_p11 }
  0x20   :  { %403 = shalt.err (!%p400_p1)
}
  0x21   :  { %30 = dma.hbm_to_vmem [thread:$0]  %s500_s1, 512, %s28_s15, [#allocation7]  }
  0x22   :  { %426 = dma.done.wait [#allocation4], 128  }
  0x23   :  { %427 = vsyncadd [#allocation4], 4294967168 }
  0x24   :  { %428 = dma.done.wait [#allocation7], 512  }
  0x25   :  { %429 = vsyncadd [#allocation7], 4294966784  ;;  %v57_v0 = vlaneseq  ;;  %v434_v1 = vmov 1966171168   ;;  %v47_v6 = vld [vmem:[#allocation6] sm:$0x77] }
  0x26   :  { %v55_v2 = vunpack.c.l.s4 %v434_v1  ;;  %v48_v7 = vld [vmem:[#allocation6 + $0x8] sm:$0x77]  ;;  %v46_v8 = vld [vmem:[#allocation3] sm:$0xff]  ;;  %v337_v9 = vcombine.high %v47_v6, %v47_v6  ;;  %v336_v11 = vcombine.low %v47_v6, %v47_v6  ;;  %v49_v13 = vld [vmem:[#allocation6 + $0x10] sm:$0x77]  ;;  %vm44_vm0 = vcmask 33792  }
  0x27   :  { %v58_v3 = vshrl.u32 %v57_v0, 7  ;;  %v339_v10 = vcombine.high %v48_v7, %v48_v7  ;;  %v338_v12 = vcombine.low %v48_v7, %v48_v7  ;;  %v50_v14 = vld [vmem:[#allocation6 + $0x18] sm:$0x77]  ;;  %v53_v15 = vcombine.high %v46_v8, %v46_v8  ;;  %v305_v54 = vld [vmem:[%s501_s2] sm:$0x3]  ;;  %s436_s9 = smov [#allocation8]  }
  0x28   :  { %v56_v4 = vunpack.c.0.s8 %v55_v2  ;;  %v341_v17 = vcombine.high %v49_v13, %v49_v13  ;;  %138 = vmatprep.subr.bf16.mxu0 %v337_v9  ;;  %v343_v18 = vcombine.high %v50_v14, %v50_v14  ;;  %v340_v26 = vcombine.low %v49_v13, %v49_v13  ;;  %s326_s10 = sshll.u32 %s436_s9, 4  ;;  %s327_s10 = int_to_ptr.vmem [resolvable:$true] %s326_s10 }
  0x29   :  { %178 = vmatprep.subr.bf16.mxu1 %v339_v10  ;;  %139 = vmatpush1.bf16.xpose.msra.mxu0 %v336_v11  ;;  %v342_v27 = vcombine.low %v50_v14, %v50_v14  ;;  %v435_v32 = vmov 0.0   ;;  %s404_s2 = scalar_lea.vmem %s327_s10, 128  ;;  %p409_p3 = scmp.lt.s32.totalorder %s327_s10, %s327_s10 }
  0x2a   :  { %v59_v5 = vsub.s32 %v56_v4, %v58_v3  ;;  %179 = vmatpush1.bf16.xpose.msra.mxu1 %v338_v12  ;;  %218 = vmatprep.subr.bf16.mxu0 %v341_v17  ;;  %45 = vst.msk [vmem:[#allocation2] sm:$0x3] %vm44_vm0, %v435_v32  ;;  %p405_p2 = scmp.ne.s32.totalorder %s327_s10, %s404_s2  ;;  %p410_p4 = scmp.lt.s32.totalorder %s404_s2, %s404_s2 }
  0x2b   :  { %258 = vmatprep.subr.bf16.mxu1 %v343_v18 }
  0x2c   :  { %v60_v16 = vrot.slane %v46_v8, %v59_v5  ;;  %v67_v21 = vrot.slane %v53_v15, %v59_v5  ;;  %p411_p5 = por %p410_p4, %p409_p3 }
  0x2e   :  { %v68_v19 = vcombine.high %v60_v16, %v60_v16  ;;  %v76_v20 = vrot.slane %v60_v16, %v59_v5  ;;  %v69_v23 = vcombine.high %v67_v21, %v67_v21  ;;  %v83_v30 = vrot.slane %v67_v21, %v59_v5  ;;  %p412_p6 = pnand %p411_p5, %p405_p2 }
  0x30   :  { %v90_v22 = vrot.slane %v68_v19, %v59_v5  ;;  %v98_v24 = vcombine.high %v76_v20, %v76_v20  ;;  %v97_v28 = vrot.slane %v69_v23, %v59_v5  ;;  %v99_v31 = vcombine.high %v83_v30, %v83_v30 }
  0x31   :  { %v51_v49 = vld [vmem:[#allocation2] sm:$0x3] }
  0x32   :  { %170 = vmatprep.mubr.bf16.mxu0 %v90_v22  ;;  %v100_v25 = vcombine.high %v90_v22, %v90_v22  ;;  %v101_v29 = vcombine.high %v97_v28, %v97_v28 }
  0x33   :  { %171 = vmatmul.mubr.bf16.vlgmr.msra.gmra.mrb[0].mxu0 %v76_v20 }
  0x34   :  { %210 = vmatprep.mubr.bf16.mxu1 %v100_v25  ;;  %219 = vmatpush1.bf16.xpose.msra.mxu0 %v340_v26 }
  0x35   :  { %211 = vmatmul.mubr.bf16.vlgmr.msra.gmra.mrb[0].mxu1 %v98_v24  ;;  %250 = vmatprep.mubr.bf16.mxu0 %v97_v28 }
  0x36   :  { %259 = vmatpush1.bf16.xpose.msra.mxu1 %v342_v27  ;;  %290 = vmatprep.mubr.bf16.mxu1 %v101_v29 }
  0x3b   :  { %251 = vmatmul.mubr.bf16.vlgmr.msra.gmra.mrb[4].mxu0 %v83_v30 }
  0x3d   :  { %291 = vmatmul.mubr.bf16.vlgmr.msra.gmra.mrb[4].mxu1 %v99_v31 }
 0x106   :  { %v172_v33 = vpop.f32.mrb[0].mxu0 }
 0x107   :  { %v174_v36 = vpop.f32.mrb[1].mxu0 }
 0x108   :  { %v212_v34 = vpop.f32.mrb[0].mxu1  ;;  %v175_v38 = vpop.f32.mrb[2].mxu0 }
 0x109   :  { %v213_v35 = vadd.f32 %v212_v34, %v172_v33  ;;  %v214_v37 = vpop.f32.mrb[1].mxu1  ;;  %v176_v40 = vpop.f32.mrb[3].mxu0 }
 0x10a   :  { %v215_v39 = vpop.f32.mrb[2].mxu1 }
 0x10b   :  { %v216_v41 = vpop.f32.mrb[3].mxu1 }
 0x10e   :  { %v252_v42 = vpop.f32.mrb[4].mxu0 }
 0x10f   :  { %v253_v44 = vadd.f32 %v252_v42, %v213_v35  ;;  %v254_v45 = vpop.f32.mrb[5].mxu0 }
 0x110   :  { %v292_v43 = vpop.f32.mrb[4].mxu1  ;;  %v255_v47 = vpop.f32.mrb[6].mxu0 }
 0x111   :  { %v294_v46 = vpop.f32.mrb[5].mxu1  ;;  %v293_v50 = vadd.f32 %v292_v43, %v253_v44  ;;  %v256_v51 = vpop.f32.mrb[7].mxu0 }
 0x112   :  { %v295_v48 = vpop.f32.mrb[6].mxu1 }
 0x113   :  { %v296_v52 = vpop.f32.mrb[7].mxu1  ;;  %v298_v53 = vadd.f32 %v293_v50, %v51_v49 }
 0x115   :  { %300 = vst.msk [vmem:[#allocation2] sm:$0x3] %vm44_vm0, %v298_v53 }
 0x11c   :  { %v304_v55 = vld [vmem:[#allocation2] sm:$0x3] }
 0x11d   :  { %v306_v56 = vsub.f32 %v304_v55, %v305_v54 }
 0x11f   :  { %v307_v57 = vmul.f32 %v306_v56, %v306_v56 }
 0x121   :  { %v308_v58 = vsel %vm44_vm0, %v307_v57, 0.0 }
 0x122   :  { %309 = vadd.xlane.f32.xlu0 %v308_v58 }
 0x1af   :  { %v310_v59 = vpop.xlane.xlu0 %309 }
 0x1b0   :  { %v311_v60 = vrot.slane %v310_v59, 4 }
 0x1b2   :  { %v312_v61 = vadd.f32 %v311_v60, %v310_v59 }
 0x1b4   :  { %v313_v62 = vrot.slane %v312_v61, 2 }
 0x1b6   :  { %v314_v63 = vadd.f32 %v313_v62, %v312_v61 }
 0x1b8   :  { %v315_v0 = vrot.slane %v314_v63, 1 }
 0x1ba   :  { %v316_v1 = vadd.f32 %v315_v0, %v314_v63 }
 0x1bc   :  { %344 = vpush %v316_v1 }
 0x1ed   :  { %s345_s11 = spop %344 }
 0x1ee   :  { %v318_v2 = vstv %s345_s11 }
 0x1ef   :  { %319 = vst [vmem:[#allocation8] sm:$0xff] %v318_v2 }
 0x1f0   :  { %415 = shalt.err (!%p412_p6)
}
 0x1f1   :  { %s416_s14 = scalar_lea.hbm %s502_s3, 128 }
 0x1f2   :  { %p417_p7 = scmp.ne.s32.totalorder %s502_s3, %s416_s14  ;;  %p420_p8 = scmp.lt.u32.totalorder %s416_s14, %s502_s3 }
 0x1f4   :  { %p422_p9 = pnand %p420_p8, %p417_p7 }
 0x1f6   :  { %425 = shalt.err (!%p422_p9)
}
 0x1f7   :  { %329 = dma.vmem_to_hbm [thread:$0]  %s327_s10, 128, %s502_s3, [#allocation5]  }
 0x1f8   :  { %430 = dma.done.wait [#allocation5], 128  }
 0x1f9   :  { %431 = vsyncadd [#allocation5], 4294967168 }
 0x1fa   :  { %333 = vsyncpa [#allocation4], 1 }
 0x1fb   :  { %334 = vsyncpa [#allocation7], 1 }
 0x1fc   :  { %335 = vsyncpa [#allocation5], 1 }

</bundles_post_ra>
